<compile_context>
chip_gen: v6e
topology: v6e:2x2x1
jax: 0.10.0
libtpu: 0.0.40
codegen_flags: <defaults>
</compile_context>

<pallas_src>
import functools
import numpy as np

import jax
import jax.numpy as jnp
from jax.experimental import pallas as pl
from jax.experimental.pallas import tpu as pltpu


def _round_up(x, m):
    return ((x + m - 1) // m) * m


def _cdiv(a, b):
    return -(-a // b)


# ----------------------------------------------------------------------------
# Pallas kernel: full AcRKNCell forward (update + predict) for one time step.
#   state slab layout : [pm_u, pm_l, cov_u, cov_l, cov_s, obs, obs_var, action, 1]
#                       (B, 7*lod + lad + 1)
#   out slab layout   : [ post_mu|post_ml|post_cu|post_cl|post_cs | 0-pad ]  (Np cols)
#                       [ next_mu|next_ml|next_cu|next_cl|next_cs | 0-pad ]  (Np cols)
#                       (B, 2*Np)  with Np = round_up(5*lod, 128)
# ----------------------------------------------------------------------------
def _acrkn_kernel(state_ref, w1_ref, wbig_ref, out_ref, *, lod, lad, hidden,
                  n_pad, k_pad):
    f32 = jnp.float32

    state = state_ref[...]
    pm_u = state[:, 0 * lod:1 * lod]
    pm_l = state[:, 1 * lod:2 * lod]
    cu = state[:, 2 * lod:3 * lod]
    cl = state[:, 3 * lod:4 * lod]
    cs = state[:, 4 * lod:5 * lod]
    obs = state[:, 5 * lod:6 * lod]
    ovar = state[:, 6 * lod:7 * lod]
    act1 = state[:, 7 * lod:7 * lod + lad + 1]          # [action | 1]
    ones = state[:, 7 * lod + lad:7 * lod + lad + 1]     # (tb, 1) of 1.0

    # ------------------------- update step (in registers) -------------------
    inv_denom = 1.0 / (cu + ovar)      # one divide, reused for q_upper/q_lower
    q_u = cu * inv_denom
    q_l = cs * inv_denom
    res = obs - pm_u
    cf = 1.0 - q_u

    post_vec = jnp.concatenate(
        [pm_u + q_u * res,             # post_mu
         pm_l + q_l * res,             # post_ml
         cf * cu,                      # post_cu
         cl - q_l * cs,                # post_cl
         cf * cs],                     # post_cs
        axis=-1)                       # (tb, 5*lod)

    # -------------------------- control net ---------------------------------
    # h = ReLU([action|1] @ [W1; b1])  (Dropout treated as identity / eval mode)
    h = jnp.maximum(jnp.dot(act1, w1_ref[...], preferred_element_type=f32), 0.0)

    # --------------------------- predict step --------------------------------
    # One fused MXU matmul:
    #   [post_vec | h | 1 | 0] @ [W_trans ; W2_ext ; next_bias ; 0]  -> (tb, Np)
    #   W_trans  folds the banded (+eye) transition blocks and the A*A / A*B
    #            diagonal-propagation terms (batch independent for num_basis=1).
    #   W2_ext   is the control-net output layer zero-padded to Np columns.
    #   next_bias = [b2, elup1(log_noise)_u, elup1(log_noise)_l, 0].
    tb = post_vec.shape[0]
    k_used = 5 * lod + hidden + 1
    op_pieces = [post_vec, h, ones]
    if k_pad > k_used:
        op_pieces.append(jnp.zeros((tb, k_pad - k_used), f32))
    op = jnp.concatenate(op_pieces, axis=-1)                       # (tb, Kp)
    nxt = jnp.dot(op, wbig_ref[...], preferred_element_type=f32)   # (tb, Np)

    if n_pad > 5 * lod:
        post_pad = jnp.concatenate(
            [post_vec, jnp.zeros((tb, n_pad - 5 * lod), f32)], axis=-1)
    else:
        post_pad = post_vec
    # Single lane-dense (128-aligned) store of the whole output block.
    out_ref[...] = jnp.concatenate([post_pad, nxt], axis=-1)


# ----------------------------------------------------------------------------
# Parameter fusion (pure parameter work, hoisted out of the hot path).
# ----------------------------------------------------------------------------
def _prepare_fused_params(params, lod):
    dt = jnp.float32
    nb = params["tm11"].shape[0]
    if nb != 1:
        # TODO(synk): general num_basis > 1 mixing path not implemented.
        raise NotImplementedError("only num_basis=1 (default config) is supported")

    band = params["band_mask"]
    eye = params["eye"]
    t11 = params["tm11"][0] * band + eye
    t12 = params["tm12"][0] * band
    t21 = params["tm21"][0] * band
    t22 = params["tm22"][0] * band + eye

    Z = jnp.zeros((lod, lod), dt)
    # Block rows (K): [post_mu, post_ml, post_cu, post_cl, post_cs]
    # Block cols (N): [next_mu, next_ml, next_cu, next_cl, next_cs]
    row_mu = jnp.concatenate([t11.T, t21.T, Z, Z, Z], axis=1)
    row_ml = jnp.concatenate([t12.T, t22.T, Z, Z, Z], axis=1)
    row_cu = jnp.concatenate([Z, Z, (t11 * t11).T, (t21 * t21).T, (t21 * t11).T], axis=1)
    row_cl = jnp.concatenate([Z, Z, (t12 * t12).T, (t22 * t22).T, (t22 * t12).T], axis=1)
    row_cs = jnp.concatenate([Z, Z, 2.0 * (t11 * t12).T, 2.0 * (t21 * t22).T,
                              (t22 * t11 + t21 * t12).T], axis=1)
    w_trans = jnp.concatenate([row_mu, row_ml, row_cu, row_cl, row_cs], axis=0)  # (5l,5l)

    w1 = params["ctrl_w1"]                                 # (lad, H)
    b1 = params["ctrl_b1"]                                 # (H,)
    H = w1.shape[-1]
    w1_ext = jnp.concatenate([w1, b1[None, :]], axis=0)    # (lad+1, H), b1 folded

    n_out = 5 * lod
    n_pad = _round_up(n_out, 128)                          # lane-dense output width
    k_used = n_out + H + 1
    k_pad = _round_up(k_used, 128)

    # elup1 transition noise hoisted out of the kernel.
    ltn = params["log_trans_noise"]                        # (1, 2*lod)
    tcov = jnp.where(ltn < 0.0, jnp.exp(ltn), ltn + 1.0)
    next_bias = jnp.concatenate(
        [params["ctrl_b2"][None, :], tcov[:, :lod], tcov[:, lod:]], axis=1)  # (1, 4*lod)
    next_bias = jnp.pad(next_bias, ((0, 0), (0, n_pad - 4 * lod)))

    w_trans_p = jnp.pad(w_trans, ((0, 0), (0, n_pad - n_out)))          # (5l, Np)
    w2_p = jnp.pad(params["ctrl_w2"], ((0, 0), (0, n_pad - 2 * lod)))   # (H,  Np)
    rows = [w_trans_p, w2_p, next_bias]
    if k_pad > k_used:
        rows.append(jnp.zeros((k_pad - k_used, n_pad), dt))
    w_big = jnp.concatenate(rows, axis=0)                               # (Kp, Np)

    # NOTE: for num_basis=1 the coefficient net's softmax output is identically
    # 1.0, so coeff_w / coeff_b are dead parameters and are not passed in.
    return w1_ext, w_big, H, n_pad, k_pad


# ----------------------------------------------------------------------------
# Batch tiling: big tiles (grid-step overhead dominates), but keep >=2 grid
# steps when each step still has a healthy number of rows so v7x's two
# TensorCores both get work via the "parallel" dimension semantics.
# ----------------------------------------------------------------------------
def _choose_tiling(B, tile_b):
    b8 = _round_up(max(B, 1), 8)
    t = max(8, min(tile_b, b8))
    grid = _cdiv(b8, t)
    if grid == 1 and b8 >= 512:
        grid = 2
    t = _round_up(_cdiv(b8, grid), 8)      # rebalance tile to minimize padding
    bp = t * grid
    return t, bp, grid


# ----------------------------------------------------------------------------
# Wrapper: packing, pallas_call with batch grid, output slicing.
# ----------------------------------------------------------------------------
def acrkn_cell_forward(params, prior_mean, prior_cov, action, obs, obs_var,
                       *, tile_b=1024):
    lod = obs.shape[-1]
    lsd = 2 * lod
    B = prior_mean.shape[0]
    lad = action.shape[-1]
    dt = jnp.float32

    w1_ext, w_big, H, n_pad, k_pad = _prepare_fused_params(params, lod)

    cov_u, cov_l, cov_s = prior_cov
    ones_col = jnp.ones((B, 1), dt)
    # One lane-dense per-batch input slab (prior_mean already = [pm_u | pm_l]).
    state = jnp.concatenate(
        [prior_mean, cov_u, cov_l, cov_s, obs, obs_var, action, ones_col],
        axis=-1).astype(dt)                                   # (B, 7*lod + lad + 1)
    state_w = state.shape[-1]

    tb, Bp, grid_b = _choose_tiling(B, tile_b)
    if Bp != B:
        # pad value 1.0 keeps the update-step denominator strictly positive on
        # the garbage rows (they are sliced off after the call).
        state = jnp.pad(state, ((0, Bp - B), (0, 0)), constant_values=1.0)

    out_w = 2 * n_pad
    kernel = functools.partial(_acrkn_kernel, lod=lod, lad=lad, hidden=H,
                               n_pad=n_pad, k_pad=k_pad)

    # Explicit VMEM budget only needed when sweeping very large batch tiles.
    vmem_est = 4 * (2 * tb * state_w + 2 * tb * out_w + k_pad * n_pad
                    + (lad + 1) * H)
    cp_kwargs = dict(dimension_semantics=("parallel",))
    if vmem_est > 12 * 1024 * 1024:
        cp_kwargs["vmem_limit_bytes"] = int(min(2 * vmem_est, 100 * 1024 * 1024))

    out_slab = pl.pallas_call(
        kernel,
        grid=(grid_b,),
        in_specs=[
            pl.BlockSpec((tb, state_w), lambda i: (i, 0)),     # fused state slab
            pl.BlockSpec((lad + 1, H), lambda i: (0, 0)),      # control [W1; b1]
            pl.BlockSpec((k_pad, n_pad), lambda i: (0, 0)),    # fused predict weight
        ],
        out_specs=pl.BlockSpec((tb, out_w), lambda i: (i, 0)),
        out_shape=jax.ShapeDtypeStruct((Bp, out_w), dt),
        compiler_params=pltpu.CompilerParams(**cp_kwargs),
    )(state, w1_ext, w_big)

    out_slab = out_slab[:B]
    post = out_slab[:, :5 * lod]
    nxt = out_slab[:, n_pad:n_pad + 5 * lod]

    post_mean = post[:, :lsd]
    post_cov = [post[:, lsd:lsd + lod],
                post[:, lsd + lod:lsd + 2 * lod],
                post[:, lsd + 2 * lod:]]
    next_mean = nxt[:, :lsd]
    next_cov = [nxt[:, lsd:lsd + lod],
                nxt[:, lsd + lod:lsd + 2 * lod],
                nxt[:, lsd + 2 * lod:]]
    return post_mean, post_cov, next_mean, next_cov


# ----------------------------------------------------------------------------
# Pure-JAX reference (mirrors the PyTorch module) for verification.
# ----------------------------------------------------------------------------
def reference_forward(params, prior_mean, prior_cov, action, obs, obs_var):
    lod = obs.shape[-1]
    cu, cl, cs = prior_cov

    denom = cu + obs_var
    qu = cu / denom
    ql = cs / denom
    res = obs - prior_mean[:, :lod]
    post_mean = prior_mean + jnp.concatenate([qu * res, ql * res], axis=-1)
    cf = 1.0 - qu
    post_cu = cf * cu
    post_cl = cl - ql * cs
    post_cs = cf * cs

    logits = post_mean @ params["coeff_w"] + params["coeff_b"]
    coeff = jax.nn.softmax(logits, axis=-1)[:, :, None, None]

    band = params["band_mask"]
    eye = params["eye"]
    tm11 = (coeff * params["tm11"][None]).sum(1) * band + eye
    tm12 = (coeff * params["tm12"][None]).sum(1) * band
    tm21 = (coeff * params["tm21"][None]).sum(1) * band
    tm22 = (coeff * params["tm22"][None]).sum(1) * band + eye

    ltn = params["log_trans_noise"]
    tcov = jnp.where(ltn < 0.0, jnp.exp(ltn), ltn + 1.0)
    tcov_u, tcov_l = tcov[:, :lod], tcov[:, lod:]

    h = jax.nn.relu(action @ params["ctrl_w1"] + params["ctrl_b1"])
    ctrl = h @ params["ctrl_w2"] + params["ctrl_b2"]

    mu = post_mean[:, :lod]
    ml = post_mean[:, lod:]

    def bmv(m, v): return jnp.einsum("bij,bj->bi", m, v)
    def dadat(a, d): return bmv(a * a, d)
    def dadbt(a, d, b): return bmv(a * b, d)

    nmu = bmv(tm11, mu) + bmv(tm12, ml)
    nml = bmv(tm21, mu) + bmv(tm22, ml)
    ncu = dadat(tm11, post_cu) + 2.0 * dadbt(tm11, post_cs, tm12) \
        + dadat(tm12, post_cl) + tcov_u
    ncl = dadat(tm21, post_cu) + 2.0 * dadbt(tm21, post_cs, tm22) \
        + dadat(tm22, post_cl) + tcov_l
    ncs = dadbt(tm21, post_cu, tm11) + dadbt(tm22, post_cs, tm11) \
        + dadbt(tm21, post_cs, tm12) + dadbt(tm22, post_cl, tm12)

    next_mean = jnp.concatenate([nmu, nml], axis=-1) + ctrl
    return (post_mean, [post_cu, post_cl, post_cs],
            next_mean, [ncu, ncl, ncs])


# ----------------------------------------------------------------------------
# Deterministic parameter construction (mirrors AcRKNCell.__init__ shapes).
# ----------------------------------------------------------------------------
def make_params(key, lod, lad, num_basis=1, bandwidth=3, ctrl_hidden=60,
                trans_covar=0.1):
    lsd = 2 * lod
    dt = jnp.float32

    k = jax.random.split(key, 6)

    np_mask = np.ones([lod, lod], dtype=np.float32)
    np_mask = np.triu(np_mask, -bandwidth) * np.tril(np_mask, bandwidth)

    eye = jnp.eye(lod, dtype=dt)
    # transition bases: module init (zeros / +-0.2*I) plus a small deterministic
    # random perturbation so the kernel exercises non-trivial matmul paths.
    tm11 = 0.05 * jax.random.normal(k[0], (num_basis, lod, lod), dtype=dt)
    tm12 = 0.2 * jnp.tile(eye[None], (num_basis, 1, 1)) \
        + 0.05 * jax.random.normal(k[1], (num_basis, lod, lod), dtype=dt)
    tm21 = -0.2 * jnp.tile(eye[None], (num_basis, 1, 1)) \
        + 0.05 * jax.random.normal(k[2], (num_basis, lod, lod), dtype=dt)
    tm22 = 0.05 * jax.random.normal(k[3], (num_basis, lod, lod), dtype=dt)

    # elup1_inv(0.1) = log(0.1)
    init_trans_cov = float(np.log(trans_covar)) if trans_covar < 1.0 else trans_covar - 1.0
    log_trans_noise = jnp.full((1, lsd), init_trans_cov, dtype=dt)

    kc = jax.random.split(k[4], 2)
    coeff_w = 0.1 * jax.random.normal(kc[0], (lsd, num_basis), dtype=dt)
    coeff_b = 0.1 * jax.random.normal(kc[1], (num_basis,), dtype=dt)

    kn = jax.random.split(k[5], 4)
    ctrl_w1 = 0.1 * jax.random.normal(kn[0], (lad, ctrl_hidden), dtype=dt)
    ctrl_b1 = 0.1 * jax.random.normal(kn[1], (ctrl_hidden,), dtype=dt)
    ctrl_w2 = 0.1 * jax.random.normal(kn[2], (ctrl_hidden, lsd), dtype=dt)
    ctrl_b2 = 0.1 * jax.random.normal(kn[3], (lsd,), dtype=dt)

    return dict(
        coeff_w=coeff_w, coeff_b=coeff_b,
        ctrl_w1=ctrl_w1, ctrl_b1=ctrl_b1, ctrl_w2=ctrl_w2, ctrl_b2=ctrl_b2,
        tm11=tm11, tm12=tm12, tm21=tm21, tm22=tm22,
        band_mask=jnp.asarray(np_mask, dtype=dt),
        eye=eye,
        log_trans_noise=log_trans_noise,
    )


def _make_inputs(key, B, lod, lad):
    lsd = 2 * lod
    dt = jnp.float32
    kk = jax.random.split(key, 7)
    prior_mean = jax.random.normal(kk[0], (B, lsd), dtype=dt)
    # covariances must be positive
    cov_u = 0.5 + jax.random.uniform(kk[1], (B, lod), dtype=dt)
    cov_l = 0.5 + jax.random.uniform(kk[2], (B, lod), dtype=dt)
    cov_s = 0.1 * jax.random.normal(kk[3], (B, lod), dtype=dt)
    action = jax.random.normal(kk[4], (B, lad), dtype=dt)
    obs = jax.random.normal(kk[5], (B, lod), dtype=dt)
    obs_var = 0.1 + jax.random.uniform(kk[6], (B, lod), dtype=dt)
    return prior_mean, [cov_u, cov_l, cov_s], action, obs, obs_var


def _check(out, ref):
    post_mean, post_cov, next_mean, next_cov = out
    r_post_mean, r_post_cov, r_next_mean, r_next_cov = ref
    np.testing.assert_allclose(np.asarray(post_mean), np.asarray(r_post_mean),
                               rtol=1e-5, atol=1e-5)
    np.testing.assert_allclose(np.asarray(next_mean), np.asarray(r_next_mean),
                               rtol=1e-5, atol=1e-5)
    for a, b in zip(post_cov, r_post_cov):
        np.testing.assert_allclose(np.asarray(a), np.asarray(b),
                                   rtol=1e-5, atol=1e-5)
    for a, b in zip(next_cov, r_next_cov):
        np.testing.assert_allclose(np.asarray(a), np.asarray(b),
                                   rtol=1e-5, atol=1e-5)


if __name__ == "__main__":
    lod, lad = 16, 4

    key = jax.random.PRNGKey(0)
    kp, kd1, kd2 = jax.random.split(key, 3)
    params = make_params(kp, lod, lad)

    # Case 1: tiny batch (single grid step, no padding).
    pm, pc, act, obs, ov = _make_inputs(kd1, 8, lod, lad)
    out = acrkn_cell_forward(params, pm, pc, act, obs, ov)
    out = jax.block_until_ready(out)
    _check(out, reference_forward(params, pm, pc, act, obs, ov))

    # Case 2: moderate batch — exercises the 2-step grid split (v7x megacore
    # path) and padded batch rows.
    pm, pc, act, obs, ov = _make_inputs(kd2, 530, lod, lad)
    out = acrkn_cell_forward(params, pm, pc, act, obs, ov)
    out = jax.block_until_ready(out)
    _check(out, reference_forward(params, pm, pc, act, obs, ov))

    print("KERNEL_OK")
</pallas_src>

<mosaic_0001>
module attributes {stable_mosaic.version = 11 : i64} {
  func.func @_acrkn_kernel(%arg0: i32, %arg1: memref<8x117xf32, #tpu.memory_space<vmem>>, %arg2: memref<5x60xf32, #tpu.memory_space<vmem>>, %arg3: memref<256x128xf32, #tpu.memory_space<vmem>>, %arg4: memref<8x256xf32, #tpu.memory_space<vmem>>) attributes {dimension_semantics = [#tpu.dimension_semantics<parallel>], iteration_bounds = array<i64: 1>, scalar_prefetch = 0 : i64, scratch_operands = 0 : i64, tpu.core_type = #tpu.core_type<tc>, window_params = [{transform_indices = @transform_0, window_bounds = array<i64: 8, 117>}, {pipeline_mode = #tpu.pipeline_mode<synchronous>, transform_indices = @transform_1, window_bounds = array<i64: 5, 60>}, {pipeline_mode = #tpu.pipeline_mode<synchronous>, transform_indices = @transform_2, window_bounds = array<i64: 256, 128>}, {transform_indices = @transform_3, window_bounds = array<i64: 8, 256>}]} {
    %c0 = arith.constant 0 : index
    %c0_0 = arith.constant 0 : index
    %0 = vector.load %arg1[%c0, %c0_0] : memref<8x117xf32, #tpu.memory_space<vmem>>, vector<8x117xf32>
    %1 = vector.extract_strided_slice %0 {offsets = [0, 0], sizes = [8, 16], strides = [1, 1]} : vector<8x117xf32> to vector<8x16xf32>
    %2 = vector.extract_strided_slice %0 {offsets = [0, 16], sizes = [8, 16], strides = [1, 1]} : vector<8x117xf32> to vector<8x16xf32>
    %3 = vector.extract_strided_slice %0 {offsets = [0, 32], sizes = [8, 16], strides = [1, 1]} : vector<8x117xf32> to vector<8x16xf32>
    %4 = vector.extract_strided_slice %0 {offsets = [0, 48], sizes = [8, 16], strides = [1, 1]} : vector<8x117xf32> to vector<8x16xf32>
    %5 = vector.extract_strided_slice %0 {offsets = [0, 64], sizes = [8, 16], strides = [1, 1]} : vector<8x117xf32> to vector<8x16xf32>
    %6 = vector.extract_strided_slice %0 {offsets = [0, 80], sizes = [8, 16], strides = [1, 1]} : vector<8x117xf32> to vector<8x16xf32>
    %7 = vector.extract_strided_slice %0 {offsets = [0, 96], sizes = [8, 16], strides = [1, 1]} : vector<8x117xf32> to vector<8x16xf32>
    %8 = vector.extract_strided_slice %0 {offsets = [0, 112], sizes = [8, 5], strides = [1, 1]} : vector<8x117xf32> to vector<8x5xf32>
    %9 = vector.extract_strided_slice %0 {offsets = [0, 116], sizes = [8, 1], strides = [1, 1]} : vector<8x117xf32> to vector<8x1xf32>
    %10 = arith.addf %3, %7 : vector<8x16xf32>
    %cst = arith.constant 1.000000e+00 : f32
    %11 = vector.broadcast %cst : f32 to vector<8x16xf32>
    %12 = arith.divf %11, %10 : vector<8x16xf32>
    %13 = arith.mulf %3, %12 : vector<8x16xf32>
    %14 = arith.mulf %5, %12 : vector<8x16xf32>
    %15 = arith.subf %6, %1 : vector<8x16xf32>
    %cst_1 = arith.constant 1.000000e+00 : f32
    %16 = vector.broadcast %cst_1 : f32 to vector<8x16xf32>
    %17 = arith.subf %16, %13 : vector<8x16xf32>
    %18 = arith.mulf %13, %15 : vector<8x16xf32>
    %19 = arith.addf %1, %18 : vector<8x16xf32>
    %20 = arith.mulf %14, %15 : vector<8x16xf32>
    %21 = arith.addf %2, %20 : vector<8x16xf32>
    %22 = arith.mulf %17, %3 : vector<8x16xf32>
    %23 = arith.mulf %14, %5 : vector<8x16xf32>
    %24 = arith.subf %4, %23 : vector<8x16xf32>
    %25 = arith.mulf %17, %5 : vector<8x16xf32>
    %26 = tpu.concatenate %19, %21, %22, %24, %25 in 1 : vector<8x16xf32>, vector<8x16xf32>, vector<8x16xf32>, vector<8x16xf32>, vector<8x16xf32> -> vector<8x80xf32>
    %c0_2 = arith.constant 0 : index
    %c0_3 = arith.constant 0 : index
    %27 = vector.load %arg2[%c0_2, %c0_3] : memref<5x60xf32, #tpu.memory_space<vmem>>, vector<5x60xf32>
    %cst_4 = arith.constant dense<0.000000e+00> : vector<8x60xf32>
    %28 = tpu.matmul %8, %27, %cst_4 {dimension_numbers = #tpu.dot_dimension_numbers<[1], [0], [0], [1], [0, 0, 1, 1], [], []>} : vector<8x5xf32>, vector<5x60xf32>, vector<8x60xf32> -> vector<8x60xf32>
    %cst_5 = arith.constant 0.000000e+00 : f32
    %29 = vector.broadcast %cst_5 : f32 to vector<8x60xf32>
    %30 = arith.maximumf %28, %29 : vector<8x60xf32>
    %cst_6 = arith.constant 0.000000e+00 : f32
    %31 = vector.broadcast %cst_6 : f32 to vector<8x115xf32>
    %32 = tpu.concatenate %26, %30, %9, %31 in 1 : vector<8x80xf32>, vector<8x60xf32>, vector<8x1xf32>, vector<8x115xf32> -> vector<8x256xf32>
    %c0_7 = arith.constant 0 : index
    %c0_8 = arith.constant 0 : index
    %33 = vector.load %arg3[%c0_7, %c0_8] : memref<256x128xf32, #tpu.memory_space<vmem>>, vector<256x128xf32>
    %cst_9 = arith.constant dense<0.000000e+00> : vector<8x128xf32>
    %34 = tpu.matmul %32, %33, %cst_9 {dimension_numbers = #tpu.dot_dimension_numbers<[1], [0], [0], [1], [0, 0, 1, 1], [], []>} : vector<8x256xf32>, vector<256x128xf32>, vector<8x128xf32> -> vector<8x128xf32>
    %cst_10 = arith.constant 0.000000e+00 : f32
    %35 = vector.broadcast %cst_10 : f32 to vector<8x48xf32>
    %36 = tpu.concatenate %26, %35 in 1 : vector<8x80xf32>, vector<8x48xf32> -> vector<8x128xf32>
    %37 = tpu.concatenate %36, %34 in 1 : vector<8x128xf32>, vector<8x128xf32> -> vector<8x256xf32>
    %c0_11 = arith.constant 0 : index
    %c0_12 = arith.constant 0 : index
    %38 = vector.load %arg4[%c0_11, %c0_12] : memref<8x256xf32, #tpu.memory_space<vmem>>, vector<8x256xf32>
    tpu.vector_store %arg4[%c0_11, %c0_12], %37 {strides = array<i32>} : memref<8x256xf32, #tpu.memory_space<vmem>>, vector<8x256xf32>,
    return
  }
  func.func @transform_0(%arg0: i32) -> (i32, i32) {
    %c0_i32 = arith.constant 0 : i32
    %c0_i32_0 = arith.constant 0 : i32
    return %arg0, %c0_i32 : i32, i32
  }
  func.func @transform_1(%arg0: i32) -> (i32, i32) {
    %c0_i32 = arith.constant 0 : i32
    %c0_i32_0 = arith.constant 0 : i32
    %c0_i32_1 = arith.constant 0 : i32
    return %c0_i32, %c0_i32_0 : i32, i32
  }
  func.func @transform_2(%arg0: i32) -> (i32, i32) {
    %c0_i32 = arith.constant 0 : i32
    %c0_i32_0 = arith.constant 0 : i32
    %c0_i32_1 = arith.constant 0 : i32
    return %c0_i32, %c0_i32_0 : i32, i32
  }
  func.func @transform_3(%arg0: i32) -> (i32, i32) {
    %c0_i32 = arith.constant 0 : i32
    %c0_i32_0 = arith.constant 0 : i32
    return %arg0, %c0_i32 : i32, i32
  }
}

</mosaic_0001>

<bundles_post_ra>
// kernel: tpu_custom_call.1
= control target key start
LH: loop header
LB: loop body
LE: loop exit
PB: predicated region body
PF: predicated region fallthrough
CT: control target
= control target key end

     0   :  { %8 = vsyncpa [#allocation3], 0  ;;  %s553_s0 = inlined_call_operand.hbm [shape: f32[8,117], index: 0, kind: input, shape index: {}]   ;;  %s554_s1 = inlined_call_operand.hbm [shape: f32[5,60], index: 1, kind: input, shape index: {}]   ;;  %s555_s2 = inlined_call_operand.hbm [shape: f32[256,128], index: 2, kind: input, shape index: {}]   ;;  %s556_s3 = inlined_call_operand.hbm [shape: f32[8,256], index: 3, kind: output, shape index: {}]  }
   0x1   :  { %9 = vsyncpa [#allocation6], 0 }
   0x2   :  { %10 = vsyncpa [#allocation4], 0  ;;  %s476_s12 = smov [#allocation5]   ;;  %s477_s14 = smov [#allocation2]  }
   0x3   :  { %s27_s13 = sshll.u32 %s476_s12, 4  ;;  %s17_s15 = sshll.u32 %s477_s14, 4  ;;  %s28_s13 = int_to_ptr.vmem [resolvable:$true] %s27_s13  ;;  %s18_s15 = int_to_ptr.vmem [resolvable:$true] %s17_s15 }
   0x4   :  { %s398_s16 = scalar_lea.vmem %s28_s13, 128  ;;  %p403_p1 = scmp.lt.s32.totalorder %s28_s13, %s28_s13 }
   0x5   :  { %p399_p0 = scmp.ne.s32.totalorder %s28_s13, %s398_s16  ;;  %p404_p2 = scmp.lt.s32.totalorder %s398_s16, %s398_s16 }
   0x7   :  { %p405_p3 = por %p404_p2, %p403_p1 }
   0x9   :  { %p406_p4 = pnand %p405_p3, %p399_p0 }
   0xb   :  { %409 = shalt.err (!%p406_p4)
}
   0xc   :  { %30 = dma.hbm_to_vmem [thread:$0]  %s554_s1, 128, %s28_s13, [#allocation6]  }
   0xd   :  { %s418_s19 = scalar_lea.vmem %s18_s15, 128  ;;  %p423_p6 = scmp.lt.s32.totalorder %s18_s15, %s18_s15 }
   0xe   :  { %p419_p5 = scmp.ne.s32.totalorder %s18_s15, %s418_s19  ;;  %p424_p7 = scmp.lt.s32.totalorder %s418_s19, %s418_s19 }
  0x10   :  { %p425_p8 = por %p424_p7, %p423_p6 }
  0x12   :  { %p426_p9 = pnand %p425_p8, %p419_p5 }
  0x14   :  { %429 = shalt.err (!%p426_p9)
}
  0x15   :  { %20 = dma.hbm_to_vmem [thread:$0]  %s553_s0, 128, %s18_s15, [#allocation3]  }
  0x16   :  { %s478_s22 = smov [#allocation7]  }
  0x17   :  { %s36_s23 = sshll.u32 %s478_s22, 4  ;;  %s37_s23 = int_to_ptr.vmem [resolvable:$true] %s36_s23 }
  0x18   :  { %s438_s24 = scalar_lea.vmem %s37_s23, 4096  ;;  %p443_p11 = scmp.lt.s32.totalorder %s37_s23, %s37_s23 }
  0x19   :  { %p439_p10 = scmp.ne.s32.totalorder %s37_s23, %s438_s24  ;;  %p444_p12 = scmp.lt.s32.totalorder %s438_s24, %s438_s24 }
  0x1b   :  { %p445_p13 = por %p444_p12, %p443_p11 }
  0x1d   :  { %p446_p0 = pnand %p445_p13, %p439_p10 }
  0x1f   :  { %449 = shalt.err (!%p446_p0)
}
  0x20   :  { %s479_s1 = smov 128   ;;  %s480_s25 = smov 8  }
  0x21   :  { %42 = dma.hbm_to_vmem [thread:$0]  %s555_s2, 4096, %s37_s23, [#allocation6], %s479_s1, %s479_s1, %s480_s25  }
  0x22   :  { %470 = dma.done.wait [#allocation3], 128  }
  0x23   :  { %471 = vsyncadd [#allocation3], 4294967168 }
  0x24   :  { %472 = dma.done.wait [#allocation6], 4224  }
  0x25   :  { %473 = vsyncadd [#allocation6], 4294963072  ;;  %v481_v0 = vmov 0.0   ;;  %vm482_vm0 = vmmov 0   ;;  %vm119_vm1 = vcmask 1044480   ;;  %v520_v1 = vld [vmem:[#allocation2] sm:$0xff] }
  0x26   :  { %368 = vmatprep.subr.mxu0 %v481_v0  ;;  %370 = vmatprep.mubr.msk.f32.mxu0 %vm482_vm0, %v481_v0  ;;  %v113_v2 = vld [vmem:[#allocation5] sm:$0x1f]  ;;  %s483_s0 = smov 80   ;;  %s484_s28 = smov 16   ;;  %vm116_vm2 = vcmask 39936   ;;  %v237_v16 = vld [vmem:[#allocation7 + $0xf0] sm:$0xff] }
  0x27   :  { %66 = vrot.lane.b32.xlu1 %v520_v1, %s483_s0  ;;  %114 = vrot.lane.b32.xlu0 %v520_v1, %s484_s28  ;;  %s485_s2 = smov 64   ;;  %s486_s29 = smov 96   ;;  %v238_v14 = vld [vmem:[#allocation7 + $0xf8] sm:$0xff]  ;;  %v221_v17 = vld [vmem:[#allocation7 + $0x70] sm:$0xff]  ;;  %v236_v19 = vld [vmem:[#allocation7 + $0xe8] sm:$0xff]  ;;  %vm105_vm3 = vcmask 130048  }
  0x28   :  { %369 = vmatpush3.msk.msra.mxu0 %vm119_vm1, %v113_v2  ;;  %s487_s30 = smov 32   ;;  %s488_s4 = smov 112   ;;  %v222_v15 = vld [vmem:[#allocation7 + $0x78] sm:$0xff]  ;;  %333 = vmatprep.subr.mxu1 %v238_v14  ;;  %v220_v21 = vld [vmem:[#allocation7 + $0x68] sm:$0xff]  ;;  %v235_v23 = vld [vmem:[#allocation7 + $0xe0] sm:$0xff]  ;;  %vm107_vm4 = vcmask 261120  }
  0x29   :  { %334 = vmatpush3.msra.mxu1 %v222_v15  ;;  %v219_v25 = vld [vmem:[#allocation7 + $0x60] sm:$0xff]  ;;  %v234_v27 = vld [vmem:[#allocation7 + $0xd8] sm:$0xff]  ;;  %v233_v30 = vld [vmem:[#allocation7 + $0xd0] sm:$0xff]  ;;  %s489_s5 = smov 24   ;;  %vm109_vm5 = vcmask 392192   ;;  %vm111_vm6 = vcmask 523264  }
  0x2a   :  { %335 = vmatprep.subr.mxu1 %v237_v16  ;;  %v218_v28 = vld [vmem:[#allocation7 + $0x58] sm:$0xff]  ;;  %v217_v31 = vld [vmem:[#allocation7 + $0x50] sm:$0xff]  ;;  %v232_v32 = vld [vmem:[#allocation7 + $0xc8] sm:$0xff]  ;;  %vm201_vm7 = vcmask 654336   ;;  %vm203_vm8 = vcmask 97280   ;;  %vm205_vm9 = vcmask 105472  }
  0x2b   :  { %54 = vrot.lane.b32.xlu0 %v520_v1, %s485_s2  ;;  %336 = vmatpush3.msra.mxu1 %v221_v17  ;;  %v216_v33 = vld [vmem:[#allocation7 + $0x48] sm:$0xff]  ;;  %v231_v34 = vld [vmem:[#allocation7 + $0xc0] sm:$0xff]  ;;  %v230_v36 = vld [vmem:[#allocation7 + $0xb8] sm:$0xff]  ;;  %s490_s6 = smov [#allocation8]  }
  0x2c   :  { %337 = vmatprep.subr.mxu1 %v236_v19  ;;  %v215_v35 = vld [vmem:[#allocation7 + $0x40] sm:$0xff]  ;;  %v214_v37 = vld [vmem:[#allocation7 + $0x38] sm:$0xff]  ;;  %v229_v38 = vld [vmem:[#allocation7 + $0xb0] sm:$0xff]  ;;  %s318_s7 = sshll.u32 %s490_s6, 4  ;;  %s319_s7 = int_to_ptr.vmem [resolvable:$true] %s318_s7 }
  0x2d   :  { %338 = vmatpush3.msra.mxu1 %v220_v21  ;;  %v213_v39 = vld [vmem:[#allocation7 + $0x30] sm:$0xff]  ;;  %v228_v40 = vld [vmem:[#allocation7 + $0xa8] sm:$0xff]  ;;  %v227_v42 = vld [vmem:[#allocation7 + $0xa0] sm:$0xff]  ;;  %s450_s8 = scalar_lea.vmem %s319_s7, 256  ;;  %p455_p2 = scmp.lt.s32.totalorder %s319_s7, %s319_s7 }
  0x2e   :  { %339 = vmatprep.subr.mxu1 %v235_v23  ;;  %v212_v41 = vld [vmem:[#allocation7 + $0x28] sm:$0xff]  ;;  %v211_v43 = vld [vmem:[#allocation7 + $0x20] sm:$0xff]  ;;  %v226_v44 = vld [vmem:[#allocation7 + $0x98] sm:$0xff]  ;;  %p451_p1 = scmp.ne.s32.totalorder %s319_s7, %s450_s8  ;;  %p456_p3 = scmp.lt.s32.totalorder %s450_s8, %s450_s8 }
  0x2f   :  { %340 = vmatpush3.msra.mxu1 %v219_v25  ;;  %v210_v45 = vld [vmem:[#allocation7 + $0x18] sm:$0xff]  ;;  %v225_v46 = vld [vmem:[#allocation7 + $0x90] sm:$0xff]  ;;  %v224_v48 = vld [vmem:[#allocation7 + $0x88] sm:$0xff] }
  0x30   :  { %341 = vmatprep.subr.mxu1 %v234_v27  ;;  %v209_v47 = vld [vmem:[#allocation7 + $0x10] sm:$0xff]  ;;  %v208_v49 = vld [vmem:[#allocation7 + $0x8] sm:$0xff]  ;;  %v223_v50 = vld [vmem:[#allocation7 + $0x80] sm:$0xff]  ;;  %p457_p4 = por %p456_p3, %p455_p2 }
  0x31   :  { %342 = vmatpush3.msra.mxu1 %v218_v28  ;;  %v207_v51 = vld [vmem:[#allocation7] sm:$0xff] }
  0x32   :  { %343 = vmatprep.subr.mxu1 %v233_v30  ;;  %p458_p5 = pnand %p457_p4, %p451_p1 }
  0x33   :  { %344 = vmatpush3.msra.mxu1 %v217_v31 }
  0x34   :  { %345 = vmatprep.subr.mxu1 %v232_v32 }
  0x35   :  { %346 = vmatpush3.msra.mxu1 %v216_v33 }
  0x36   :  { %347 = vmatprep.subr.mxu1 %v231_v34 }
  0x37   :  { %348 = vmatpush3.msra.mxu1 %v215_v35 }
  0x38   :  { %349 = vmatprep.subr.mxu1 %v230_v36 }
  0x39   :  { %350 = vmatpush3.msra.mxu1 %v214_v37 }
  0x3a   :  { %351 = vmatprep.subr.mxu1 %v229_v38 }
  0x3b   :  { %352 = vmatpush3.msra.mxu1 %v213_v39 }
  0x3c   :  { %353 = vmatprep.subr.mxu1 %v228_v40 }
  0x3d   :  { %354 = vmatpush3.msra.mxu1 %v212_v41 }
  0x3e   :  { %355 = vmatprep.subr.mxu1 %v227_v42 }
  0x3f   :  { %356 = vmatpush3.msra.mxu1 %v211_v43 }
  0x40   :  { %357 = vmatprep.subr.mxu1 %v226_v44 }
  0x41   :  { %358 = vmatpush3.msra.mxu1 %v210_v45 }
  0x42   :  { %359 = vmatprep.subr.mxu1 %v225_v46 }
  0x43   :  { %360 = vmatpush3.msra.mxu1 %v209_v47 }
  0x44   :  { %361 = vmatprep.subr.mxu1 %v224_v48 }
  0x45   :  { %362 = vmatpush3.msra.mxu1 %v208_v49 }
  0x46   :  { %363 = vmatprep.subr.mxu1 %v223_v50 }
  0x47   :  { %364 = vmatpush3.msra.mxu1 %v207_v51 }
  0x99   :  { %v67_v3 = vpop.permute.xlu1 %66  ;;  %v115_v4 = vpop.permute.xlu0 %114 }
  0x9a   :  { %v69_v5 = vsub.f32 %v520_v1, %v67_v3  ;;  %371 = vmatmul.mubr.msk.f32.vlgmr.msra.gmra.mxu0 %vm116_vm2, %v115_v4 }
  0x9c   :  { %72 = vrot.lane.b32.xlu0 %v69_v5, %s483_s0 }
  0x9d   :  { %v55_v6 = vpop.permute.xlu0 %54 }
  0x9e   :  { %v57_v7 = vadd.f32 %v55_v6, %v520_v1 }
  0xa0   :  { %388 = vrcp.f32 %v57_v7  ;;  %97 = vrot.lane.b32.xlu0 %v520_v1, %s486_s29 }
  0xad   :  { %v389_v8 = vpop.eup %388 }
  0xae   :  { %62 = vrot.lane.b32.xlu1 %v389_v8, %s487_s30  ;;  %v532_v9 = vmul.f32 %v389_v8, %v520_v1 }
  0xb0   :  { %v70_v26 = vsub.f32 1.0, %v532_v9 }
  0xb2   :  { %81 = vrot.lane.b32.xlu1 %v69_v5, %s488_s4  ;;  %v90_v61 = vmul.f32 %v70_v26, %v520_v1 }
 0x10e   :  { %v73_v10 = vpop.permute.xlu0 %72 }
 0x10f   :  { %v75_v11 = vmul.f32 %v73_v10, %v532_v9 }
 0x111   :  { %77 = vrot.lane.b32.xlu1 %v75_v11, %s486_s29 }
 0x112   :  { %v98_v24 = vpop.permute.xlu0 %97 }
 0x113   :  { %v100_v29 = vmul.f32 %v98_v24, %v70_v26 }
 0x120   :  { %v63_v12 = vpop.permute.xlu1 %62 }
 0x121   :  { %v65_v13 = vmul.f32 %v63_v12, %v520_v1 }
 0x123   :  { %v91_v18 = vmul.f32 %v65_v13, %v520_v1 }
 0x124   :  { %v82_v20 = vpop.permute.xlu1 %81 }
 0x125   :  { %v84_v22 = vmul.f32 %v82_v20, %v65_v13  ;;  %93 = vrot.lane.b32.xlu1 %v91_v18, %s488_s4 }
 0x127   :  { %86 = vrot.lane.b32.xlu0 %v84_v22, %s483_s0 }
 0x12b   :  { %102 = vrot.lane.b32.xlu0 %v100_v29, %s487_s30 }
 0x12f   :  { %198 = vrot.lane.b32.xlu0 %v520_v1, %s489_s5 }
 0x15a   :  { %v189_v52 = vpop.f32.mrf.mxu0 }
 0x15b   :  { %v193_v53 = vmax.f32 %v189_v52, 0.0 }
 0x15c   :  { %v372_v54 = vpop.f32.mrf.mxu0 }
 0x15d   :  { %195 = vrot.lane.b32.xlu1 %v193_v53, %s483_s0 }
 0x183   :  { %v78_v55 = vpop.permute.xlu1 %77 }
 0x184   :  { %v80_v58 = vadd.f32 %v78_v55, %v520_v1 }
 0x197   :  { %v94_v56 = vpop.permute.xlu1 %93 }
 0x198   :  { %v96_v60 = vsub.f32 %v520_v1, %v94_v56 }
 0x199   :  { %v87_v57 = vpop.permute.xlu0 %86 }
 0x19a   :  { %v89_v59 = vadd.f32 %v87_v57, %v520_v1 }
 0x19c   :  { %v106_v62 = vsel %vm105_vm3, %v80_v58, %v89_v59 }
 0x19d   :  { %v108_v63 = vsel %vm107_vm4, %v106_v62, %v90_v61  ;;  %v103_v0 = vpop.permute.xlu0 %102 }
 0x19e   :  { %v110_v2 = vsel %vm109_vm5, %v108_v63, %v96_v60 }
 0x19f   :  { %v112_v3 = vsel %vm111_vm6, %v110_v2, %v103_v0 }
 0x1a0   :  { %v309_v4 = vsel %vm201_vm7, %v112_v3, 0.0 }
 0x1a1   :  { %310 = vst [vmem:[#allocation8] sm:$0xff] %v309_v4  ;;  %v199_v5 = vpop.permute.xlu0 %198 }
 0x1cf   :  { %v196_v6 = vpop.permute.xlu1 %195 }
 0x1d0   :  { %v204_v7 = vsel %vm203_vm8, %v196_v6, %v199_v5  ;;  %v202_v8 = vsel %vm201_vm7, %v112_v3, %v196_v6 }
 0x1d1   :  { %330 = vmatprep.mubr.msk.f32.mxu1 %vm205_vm9, %v204_v7 }
 0x1d2   :  { %304 = vmatmul.mubr.f32.vlgmr.msra.gmra.mxu1 %v202_v8 }
 0x292   :  { %v365_v9 = vpop.f32.mrf.mxu1 }
 0x294   :  { %v366_v1 = vpop.f32.mrf.mxu1 }
 0x295   :  { %v367_v10 = vadd.f32 %v366_v1, %v365_v9 }
 0x297   :  { %311 = vst [vmem:[#allocation8 + $0x8] sm:$0xff] %v367_v10 }
 0x298   :  { %461 = shalt.err (!%p458_p5)
}
 0x299   :  { %321 = dma.vmem_to_hbm [thread:$0]  %s319_s7, 256, %s556_s3, [#allocation4]  }
 0x29a   :  { %474 = dma.done.wait [#allocation4], 256  }
 0x29b   :  { %475 = vsyncadd [#allocation4], 4294967040 }
 0x29c   :  { %325 = vsyncpa [#allocation3], 1 }
 0x29d   :  { %326 = vsyncpa [#allocation6], 1 }
 0x29e   :  { %327 = vsyncpa [#allocation4], 1 }

</bundles_post_ra>
